<compile_context>
chip_gen: v5e
topology: v5e:2x2
jax: 0.10.0
libtpu: 0.0.40
codegen_flags: <defaults>
</compile_context>

<pallas_src>
import functools
import math

import jax
import jax.numpy as jnp
from jax import lax
from jax.experimental import pallas as pl
from jax.experimental.pallas import tpu as pltpu

# ---- module configuration (FilteredNoiseShapingReverb defaults, scaled-down demo) ----
IR_LEN = 512           # ir_len (default 60000; scaled down for the demo)
SIG_LEN = 2048         # input length L
NUM_BANDS = 12         # K
NUM_CHANNELS = 2       # processor_channel='midside' -> 2 reverb channels
SR = 30000
MIN_DECAY_MS = 50.0
MAX_DECAY_MS = 2000.0
EPS = 1e-12

TAP_BLOCK = 256        # FIR tap tile (MXU contraction chunk); 256-multiple for v6e/v7x
OUT_BLOCK = 256        # FIR output tile (MXU N dim, power of two, multiple of 128)
CONV_ROW_BLOCK = 4     # rows per conv grid step (parallel axis -> megacore on v7x)
IR_T_TILE = 256        # ir-time tile of kernel 1


def _decay_bounds(sr=SR, min_decay_ms=MIN_DECAY_MS, max_decay_ms=MAX_DECAY_MS):
    min_decay_sample = min_decay_ms * sr / 1000.0
    min_decay = (-60.0 / min_decay_sample) / 20.0 * math.log(10.0)
    max_decay_sample = max_decay_ms * sr / 1000.0
    max_decay = (-60.0 / max_decay_sample) / 20.0 * math.log(10.0)
    return min_decay, max_decay


# --------------------------------------------------------------------------------
# Kernel 1: IR synthesis.  noise (K, R, T-tile), decay/gain (R, K) -> ir (R, T-tile)
# plus per-row energy accumulated across the "arbitrary" time axis.
# --------------------------------------------------------------------------------
def _ir_synth_kernel(noise_ref, dec_ref, gain_ref, ir_ref, en_ref, *, t_tile, num_bands):
    tj = pl.program_id(1)
    rows, tt = ir_ref.shape
    t0 = (tj * t_tile).astype(jnp.float32)
    t_idx = t0 + lax.broadcasted_iota(jnp.int32, (rows, tt), 1).astype(jnp.float32)

    acc = jnp.zeros((rows, tt), jnp.float32)
    # TODO(synk): factored-exp recurrence across time tiles (carry exp(t_tile*decay))
    # would cut EUP transcendental work ~T/t_tile x at production ir_len (biggest win
    # on v5e); direct exp is fine at demo sizes.
    for k in range(num_bands):
        d = dec_ref[:, k:k + 1]                      # (rows, 1)
        g = gain_ref[:, k:k + 1]                     # (rows, 1)
        env = jnp.exp(t_idx * d) * g                 # (rows, tt)
        acc = acc + noise_ref[k] * env               # per-band filtered noise, shaped

    ir_ref[...] = acc

    @pl.when(tj == 0)
    def _init():
        en_ref[...] = jnp.zeros_like(en_ref)

    en_ref[...] += jnp.sum(acc * acc, axis=1, keepdims=True)


def synthesize_ir(noise_krt, decay_rows, gain_rows):
    """noise_krt: (K, R, T); decay_rows/gain_rows: (R, K). Returns ir (R, T), energy (R, 1)."""
    K, R, T = noise_krt.shape
    rb = min(8, R)
    tt = min(IR_T_TILE, T)
    assert R % rb == 0 and T % tt == 0
    kernel = functools.partial(_ir_synth_kernel, t_tile=tt, num_bands=K)
    return pl.pallas_call(
        kernel,
        out_shape=(jax.ShapeDtypeStruct((R, T), jnp.float32),
                   jax.ShapeDtypeStruct((R, 1), jnp.float32)),
        grid_spec=pltpu.PrefetchScalarGridSpec(
            num_scalar_prefetch=0,
            grid=(R // rb, T // tt),
            in_specs=[pl.BlockSpec((K, rb, tt), lambda i, tj: (0, i, tj)),
                      pl.BlockSpec((rb, K), lambda i, tj: (i, 0)),
                      pl.BlockSpec((rb, K), lambda i, tj: (i, 0))],
            out_specs=(pl.BlockSpec((rb, tt), lambda i, tj: (i, tj)),
                       pl.BlockSpec((rb, 1), lambda i, tj: (i, 0)))),
        compiler_params=pltpu.CompilerParams(
            dimension_semantics=("parallel", "arbitrary")),
    )(noise_krt, decay_rows, gain_rows)


# --------------------------------------------------------------------------------
# Kernel 2: causal FIR  y[r, n] = sum_t h[r, t] * x[r, n - t]  as MXU matmuls.
# Per (row-block, tap-block): Toeplitz H[k, n] = q[(k - n - 1) mod W] of the reversed,
# zero-padded tap chunk q (built with static masked sublane rolls), and A (M, W) of
# overlapping input windows; y tiles accumulate A @ H in the resident output block.
# --------------------------------------------------------------------------------
def _fir_toeplitz_kernel(xp_ref, q_ref, o_ref, *, ir_len, tap_block, out_block,
                         out_tiles, rows_per_block):
    j = pl.program_id(1)
    n_tb = pl.num_programs(1)
    w = tap_block + out_block
    align = math.gcd(tap_block, out_block)

    @pl.when(j == 0)
    def _init():
        o_ref[...] = jnp.zeros_like(o_ref)

    lane = lax.broadcasted_iota(jnp.int32, (w, out_block), 1)      # column index n
    q_all = q_ref[0, 0]                                            # (w, rows_per_block)
    base = pl.multiple_of(ir_len - (j + 1) * tap_block, align)     # window offset in xp
    nbits = out_block.bit_length() - 1                             # out_block is 2**nbits

    for rr in range(rows_per_block):
        # ---- Toeplitz of the reversed taps: column n is q rolled down by (n + 1);
        #      the circular wrap lands in q's zero pad since n + 1 <= out_block.
        h = jnp.broadcast_to(q_all[:, rr:rr + 1], (w, out_block))
        h = jnp.concatenate([h[w - 1:], h[:w - 1]], axis=0)        # roll all columns by 1
        for b in range(nbits):                                     # + bit b of n
            s = 1 << b
            rolled = jnp.concatenate([h[w - s:], h[:w - s]], axis=0)
            h = jnp.where(((lane >> b) & 1) == 1, rolled, h)

        # ---- overlapping input windows, one per output tile, stacked on sublanes.
        wins = [xp_ref[0, rr:rr + 1,
                       pl.ds(pl.multiple_of(base + m * out_block, align), w)]
                for m in range(out_tiles)]
        a = jnp.concatenate(wins, axis=0)                          # (M, w)

        o_ref[0, rr] = o_ref[0, rr] + jnp.dot(a, h, preferred_element_type=jnp.float32)


def causal_fir_conv(x_rows, ir_rows, scale_rows):
    """x_rows: (R, L); ir_rows: (R, T); scale_rows: (R,) normalization. Returns (R, L)."""
    R, L = x_rows.shape
    _, T = ir_rows.shape
    TB, OB = TAP_BLOCK, OUT_BLOCK
    RB = min(CONV_ROW_BLOCK, R)
    assert T % TB == 0 and L % OB == 0 and R % RB == 0
    assert OB & (OB - 1) == 0, "OUT_BLOCK must be a power of two"
    n_tb, n_rb, M, W = T // TB, R // RB, L // OB, TB + OB

    # normalize_impulse folded into tap construction (no extra pass over the IR),
    # reversed taps per tap block with an OB zero pad for the Toeplitz wrap:
    #   Q[jj, rb, s, rr] = ir_norm[rb*RB + rr, reversed time jj*TB + s]
    ir_rev = (ir_rows * scale_rows[:, None])[:, ::-1]
    q = jnp.pad(ir_rev.T.reshape(n_tb, TB, R), ((0, 0), (0, OB), (0, 0)))
    q = q.reshape(n_tb, W, n_rb, RB).transpose(0, 2, 1, 3)          # (n_tb, n_rb, W, RB)

    # causal history pad; each padded row is DMA'd exactly once (resident per row block)
    xp = jnp.pad(x_rows.astype(jnp.float32), ((0, 0), (T, 0))).reshape(n_rb, RB, L + T)

    kernel = functools.partial(_fir_toeplitz_kernel, ir_len=T, tap_block=TB,
                               out_block=OB, out_tiles=M, rows_per_block=RB)
    out = pl.pallas_call(
        kernel,
        out_shape=jax.ShapeDtypeStruct((n_rb, RB, M, OB), jnp.float32),
        grid_spec=pltpu.PrefetchScalarGridSpec(
            num_scalar_prefetch=0,
            grid=(n_rb, n_tb),
            in_specs=[pl.BlockSpec((1, RB, L + T), lambda rb, j: (rb, 0, 0)),
                      pl.BlockSpec((1, 1, W, RB), lambda rb, j: (n_tb - 1 - j, rb, 0, 0))],
            out_specs=pl.BlockSpec((1, RB, M, OB), lambda rb, j: (rb, 0, 0, 0))),
        compiler_params=pltpu.CompilerParams(
            dimension_semantics=("parallel", "arbitrary")),
    )(xp, q)
    return out.reshape(R, L)


# --------------------------------------------------------------------------------
# Glue: midside transforms + top-level forward
# --------------------------------------------------------------------------------
def lr_to_ms(x):
    # TODO(synk): exact grafx mid/side gain convention unverified; using the
    # orthonormal (1/sqrt(2)) pair, which round-trips to identity.
    s = 1.0 / math.sqrt(2.0)
    return jnp.stack([(x[:, 0] + x[:, 1]) * s, (x[:, 0] - x[:, 1]) * s], axis=1)


def ms_to_lr(x):
    s = 1.0 / math.sqrt(2.0)
    return jnp.stack([(x[:, 0] + x[:, 1]) * s, (x[:, 0] - x[:, 1]) * s], axis=1)


def filtered_noise_shaping_reverb(input_signals, log_decay, log_gain, filtered_noise,
                                  *, min_decay, max_decay):
    """
    input_signals : (B, 2, L)  float32 stereo audio (L/R)
    log_decay     : (B, 2, K)  float32
    log_gain      : (B, 2, K)  float32
    filtered_noise: (2, K, T)  float32, pre-sliced to ir_len T
    returns       : (B, 2, L)  float32
    """
    B, C, L = input_signals.shape
    _, K, T = filtered_noise.shape
    R = B * C

    # tiny parameter transform (96 scalars) in plain JAX; kernels see (R, K) rows.
    decay_rows = (jax.nn.sigmoid(log_decay) * (max_decay - min_decay) + min_decay)
    decay_rows = decay_rows.reshape(R, K).astype(jnp.float32)
    gain_rows = log_gain.reshape(R, K).astype(jnp.float32)

    # per-row noise laid out (K, R, T) so the kernel's per-band slice is a free
    # leading-dim index (rows on sublanes, time on lanes).
    noise_krt = jnp.transpose(
        jnp.broadcast_to(filtered_noise[None].astype(jnp.float32),
                         (B, C, K, T)).reshape(R, K, T), (1, 0, 2))

    ir, energy = synthesize_ir(noise_krt, decay_rows, gain_rows)          # (R,T), (R,1)

    # normalize_impulse: per-batch 1/sqrt(mean channel energy); applied to the taps
    # while building the conv kernel's Q blocks (conv is linear, no extra IR pass).
    scale_rows = jnp.repeat(
        lax.rsqrt(jnp.mean(energy.reshape(B, C), axis=1) + EPS), C).astype(jnp.float32)

    x_ms = lr_to_ms(input_signals.astype(jnp.float32)).reshape(R, L)
    y_rows = causal_fir_conv(x_ms, ir, scale_rows)                        # (R, L)
    return ms_to_lr(y_rows.reshape(B, C, L))


# --------------------------------------------------------------------------------
# Pure-JAX reference (lightweight self-check)
# --------------------------------------------------------------------------------
def _reference_forward(x, log_decay, log_gain, noise, *, min_decay, max_decay):
    B, C, L = x.shape
    _, K, T = noise.shape
    decay = jax.nn.sigmoid(log_decay) * (max_decay - min_decay) + min_decay   # (B,C,K)
    t = jnp.arange(T, dtype=jnp.float32)
    env = jnp.exp(t[None, None, None, :] * decay[..., None]) * log_gain[..., None]
    ir = jnp.sum(noise[None] * env, axis=2)                                   # (B,C,T)
    energy = jnp.sum(ir * ir, axis=-1, keepdims=True)
    ir = ir * lax.rsqrt(jnp.mean(energy, axis=1, keepdims=True) + EPS)
    x_ms = lr_to_ms(x)
    ys = []
    for b in range(B):
        rows = []
        for c in range(C):
            rows.append(jnp.convolve(x_ms[b, c], ir[b, c], precision="highest")[:L])
        ys.append(jnp.stack(rows))
    return ms_to_lr(jnp.stack(ys))


if __name__ == "__main__":
    key = jax.random.PRNGKey(0)
    k_noise, k_start, k_x, k_dec, k_gain = jax.random.split(key, 5)

    B, C, K = 4, NUM_CHANNELS, NUM_BANDS          # B*C = 8 rows -> full sublanes
    T, L = IR_LEN, SIG_LEN

    # 'pseudo-random' noise buffer of length 5 * ir_len, deterministic slice.
    # TODO(synk): grafx get_filtered_noise applies a zero-phase crossover filterbank;
    # here each band is raw deterministic uniform noise.
    noise_len = T * 5
    noise_buf = jax.random.uniform(k_noise, (C, K, noise_len), jnp.float32, -1.0, 1.0)
    start = int(jax.random.randint(k_start, (), 0, noise_len - T))
    filtered_noise = lax.dynamic_slice_in_dim(noise_buf, start, T, axis=2)    # (C,K,T)

    x = jax.random.normal(k_x, (B, C, L), jnp.float32)
    log_decay = jax.random.normal(k_dec, (B, C, K), jnp.float32)
    log_gain = 0.1 * jax.random.normal(k_gain, (B, C, K), jnp.float32)
    # TODO(synk): use_fade_in (log_fade_in / z_fade_in_gain) path not implemented
    # (module default is use_fade_in=False).

    min_decay, max_decay = _decay_bounds()
    out = filtered_noise_shaping_reverb(x, log_decay, log_gain, filtered_noise,
                                        min_decay=min_decay, max_decay=max_decay)
    out = jax.block_until_ready(out)
    assert out.shape == (B, C, L)
    assert bool(jnp.all(jnp.isfinite(out)))

    ref = _reference_forward(x, log_decay, log_gain, filtered_noise,
                             min_decay=min_decay, max_decay=max_decay)
    err = float(jnp.max(jnp.abs(out - ref)))
    assert err < 2e-2, f"max abs error vs reference: {err}"
    print("KERNEL_OK")
</pallas_src>

<mosaic_0001>
module attributes {stable_mosaic.version = 11 : i64} {
  func.func @_ir_synth_kernel(%arg0: i32, %arg1: i32, %arg2: memref<12x8x256xf32, #tpu.memory_space<vmem>>, %arg3: memref<8x12xf32, #tpu.memory_space<vmem>>, %arg4: memref<8x12xf32, #tpu.memory_space<vmem>>, %arg5: memref<8x256xf32, #tpu.memory_space<vmem>>, %arg6: memref<8x1xf32, #tpu.memory_space<vmem>>) attributes {dimension_semantics = [#tpu.dimension_semantics<parallel>, #tpu.dimension_semantics<arbitrary>], iteration_bounds = array<i64: 1, 2>, scalar_prefetch = 0 : i64, scratch_operands = 0 : i64, tpu.core_type = #tpu.core_type<tc>, window_params = [{transform_indices = @transform_0, window_bounds = array<i64: 12, 8, 256>}, {transform_indices = @transform_1, window_bounds = array<i64: 8, 12>}, {transform_indices = @transform_2, window_bounds = array<i64: 8, 12>}, {transform_indices = @transform_3, window_bounds = array<i64: 8, 256>}, {transform_indices = @transform_4, window_bounds = array<i64: 8, 1>}]} {
    %c256_i32 = arith.constant 256 : i32
    %0 = arith.muli %arg1, %c256_i32 : i32
    %1 = arith.sitofp %0 : i32 to f32
    %2 = tpu.iota {dimensions = array<i32: 1>} : vector<8x256xi32>
    %3 = arith.sitofp %2 : vector<8x256xi32> to vector<8x256xf32>
    %4 = vector.broadcast %1 : f32 to vector<8x256xf32>
    %5 = arith.addf %4, %3 : vector<8x256xf32>
    %cst = arith.constant 0.000000e+00 : f32
    %6 = vector.broadcast %cst : f32 to vector<8x256xf32>
    %c0 = arith.constant 0 : index
    %c0_0 = arith.constant 0 : index
    %7 = vector.load %arg3[%c0, %c0_0] : memref<8x12xf32, #tpu.memory_space<vmem>>, vector<8x1xf32>
    %c0_1 = arith.constant 0 : index
    %c0_2 = arith.constant 0 : index
    %8 = vector.load %arg4[%c0_1, %c0_2] : memref<8x12xf32, #tpu.memory_space<vmem>>, vector<8x1xf32>
    %9 = vector.broadcast %7 : vector<8x1xf32> to vector<8x256xf32>
    %10 = arith.mulf %5, %9 : vector<8x256xf32>
    %11 = math.exp %10 : vector<8x256xf32>
    %12 = vector.broadcast %8 : vector<8x1xf32> to vector<8x256xf32>
    %13 = arith.mulf %11, %12 : vector<8x256xf32>
    %c0_3 = arith.constant 0 : index
    %c0_4 = arith.constant 0 : index
    %c0_5 = arith.constant 0 : index
    %14 = vector.load %arg2[%c0_3, %c0_4, %c0_5] : memref<12x8x256xf32, #tpu.memory_space<vmem>>, vector<1x8x256xf32>
    %15 = vector.shape_cast %14 : vector<1x8x256xf32> to vector<8x256xf32>
    %16 = arith.mulf %15, %13 : vector<8x256xf32>
    %17 = arith.addf %6, %16 : vector<8x256xf32>
    %c0_6 = arith.constant 0 : index
    %c1 = arith.constant 1 : index
    %18 = vector.load %arg3[%c0_6, %c1] : memref<8x12xf32, #tpu.memory_space<vmem>>, vector<8x1xf32>
    %c0_7 = arith.constant 0 : index
    %c1_8 = arith.constant 1 : index
    %19 = vector.load %arg4[%c0_7, %c1_8] : memref<8x12xf32, #tpu.memory_space<vmem>>, vector<8x1xf32>
    %20 = vector.broadcast %18 : vector<8x1xf32> to vector<8x256xf32>
    %21 = arith.mulf %5, %20 : vector<8x256xf32>
    %22 = math.exp %21 : vector<8x256xf32>
    %23 = vector.broadcast %19 : vector<8x1xf32> to vector<8x256xf32>
    %24 = arith.mulf %22, %23 : vector<8x256xf32>
    %c1_9 = arith.constant 1 : index
    %c0_10 = arith.constant 0 : index
    %c0_11 = arith.constant 0 : index
    %25 = vector.load %arg2[%c1_9, %c0_10, %c0_11] : memref<12x8x256xf32, #tpu.memory_space<vmem>>, vector<1x8x256xf32>
    %26 = vector.shape_cast %25 : vector<1x8x256xf32> to vector<8x256xf32>
    %27 = arith.mulf %26, %24 : vector<8x256xf32>
    %28 = arith.addf %17, %27 : vector<8x256xf32>
    %c0_12 = arith.constant 0 : index
    %c2 = arith.constant 2 : index
    %29 = vector.load %arg3[%c0_12, %c2] : memref<8x12xf32, #tpu.memory_space<vmem>>, vector<8x1xf32>
    %c0_13 = arith.constant 0 : index
    %c2_14 = arith.constant 2 : index
    %30 = vector.load %arg4[%c0_13, %c2_14] : memref<8x12xf32, #tpu.memory_space<vmem>>, vector<8x1xf32>
    %31 = vector.broadcast %29 : vector<8x1xf32> to vector<8x256xf32>
    %32 = arith.mulf %5, %31 : vector<8x256xf32>
    %33 = math.exp %32 : vector<8x256xf32>
    %34 = vector.broadcast %30 : vector<8x1xf32> to vector<8x256xf32>
    %35 = arith.mulf %33, %34 : vector<8x256xf32>
    %c2_15 = arith.constant 2 : index
    %c0_16 = arith.constant 0 : index
    %c0_17 = arith.constant 0 : index
    %36 = vector.load %arg2[%c2_15, %c0_16, %c0_17] : memref<12x8x256xf32, #tpu.memory_space<vmem>>, vector<1x8x256xf32>
    %37 = vector.shape_cast %36 : vector<1x8x256xf32> to vector<8x256xf32>
    %38 = arith.mulf %37, %35 : vector<8x256xf32>
    %39 = arith.addf %28, %38 : vector<8x256xf32>
    %c0_18 = arith.constant 0 : index
    %c3 = arith.constant 3 : index
    %40 = vector.load %arg3[%c0_18, %c3] : memref<8x12xf32, #tpu.memory_space<vmem>>, vector<8x1xf32>
    %c0_19 = arith.constant 0 : index
    %c3_20 = arith.constant 3 : index
    %41 = vector.load %arg4[%c0_19, %c3_20] : memref<8x12xf32, #tpu.memory_space<vmem>>, vector<8x1xf32>
    %42 = vector.broadcast %40 : vector<8x1xf32> to vector<8x256xf32>
    %43 = arith.mulf %5, %42 : vector<8x256xf32>
    %44 = math.exp %43 : vector<8x256xf32>
    %45 = vector.broadcast %41 : vector<8x1xf32> to vector<8x256xf32>
    %46 = arith.mulf %44, %45 : vector<8x256xf32>
    %c3_21 = arith.constant 3 : index
    %c0_22 = arith.constant 0 : index
    %c0_23 = arith.constant 0 : index
    %47 = vector.load %arg2[%c3_21, %c0_22, %c0_23] : memref<12x8x256xf32, #tpu.memory_space<vmem>>, vector<1x8x256xf32>
    %48 = vector.shape_cast %47 : vector<1x8x256xf32> to vector<8x256xf32>
    %49 = arith.mulf %48, %46 : vector<8x256xf32>
    %50 = arith.addf %39, %49 : vector<8x256xf32>
    %c0_24 = arith.constant 0 : index
    %c4 = arith.constant 4 : index
    %51 = vector.load %arg3[%c0_24, %c4] : memref<8x12xf32, #tpu.memory_space<vmem>>, vector<8x1xf32>
    %c0_25 = arith.constant 0 : index
    %c4_26 = arith.constant 4 : index
    %52 = vector.load %arg4[%c0_25, %c4_26] : memref<8x12xf32, #tpu.memory_space<vmem>>, vector<8x1xf32>
    %53 = vector.broadcast %51 : vector<8x1xf32> to vector<8x256xf32>
    %54 = arith.mulf %5, %53 : vector<8x256xf32>
    %55 = math.exp %54 : vector<8x256xf32>
    %56 = vector.broadcast %52 : vector<8x1xf32> to vector<8x256xf32>
    %57 = arith.mulf %55, %56 : vector<8x256xf32>
    %c4_27 = arith.constant 4 : index
    %c0_28 = arith.constant 0 : index
    %c0_29 = arith.constant 0 : index
    %58 = vector.load %arg2[%c4_27, %c0_28, %c0_29] : memref<12x8x256xf32, #tpu.memory_space<vmem>>, vector<1x8x256xf32>
    %59 = vector.shape_cast %58 : vector<1x8x256xf32> to vector<8x256xf32>
    %60 = arith.mulf %59, %57 : vector<8x256xf32>
    %61 = arith.addf %50, %60 : vector<8x256xf32>
    %c0_30 = arith.constant 0 : index
    %c5 = arith.constant 5 : index
    %62 = vector.load %arg3[%c0_30, %c5] : memref<8x12xf32, #tpu.memory_space<vmem>>, vector<8x1xf32>
    %c0_31 = arith.constant 0 : index
    %c5_32 = arith.constant 5 : index
    %63 = vector.load %arg4[%c0_31, %c5_32] : memref<8x12xf32, #tpu.memory_space<vmem>>, vector<8x1xf32>
    %64 = vector.broadcast %62 : vector<8x1xf32> to vector<8x256xf32>
    %65 = arith.mulf %5, %64 : vector<8x256xf32>
    %66 = math.exp %65 : vector<8x256xf32>
    %67 = vector.broadcast %63 : vector<8x1xf32> to vector<8x256xf32>
    %68 = arith.mulf %66, %67 : vector<8x256xf32>
    %c5_33 = arith.constant 5 : index
    %c0_34 = arith.constant 0 : index
    %c0_35 = arith.constant 0 : index
    %69 = vector.load %arg2[%c5_33, %c0_34, %c0_35] : memref<12x8x256xf32, #tpu.memory_space<vmem>>, vector<1x8x256xf32>
    %70 = vector.shape_cast %69 : vector<1x8x256xf32> to vector<8x256xf32>
    %71 = arith.mulf %70, %68 : vector<8x256xf32>
    %72 = arith.addf %61, %71 : vector<8x256xf32>
    %c0_36 = arith.constant 0 : index
    %c6 = arith.constant 6 : index
    %73 = vector.load %arg3[%c0_36, %c6] : memref<8x12xf32, #tpu.memory_space<vmem>>, vector<8x1xf32>
    %c0_37 = arith.constant 0 : index
    %c6_38 = arith.constant 6 : index
    %74 = vector.load %arg4[%c0_37, %c6_38] : memref<8x12xf32, #tpu.memory_space<vmem>>, vector<8x1xf32>
    %75 = vector.broadcast %73 : vector<8x1xf32> to vector<8x256xf32>
    %76 = arith.mulf %5, %75 : vector<8x256xf32>
    %77 = math.exp %76 : vector<8x256xf32>
    %78 = vector.broadcast %74 : vector<8x1xf32> to vector<8x256xf32>
    %79 = arith.mulf %77, %78 : vector<8x256xf32>
    %c6_39 = arith.constant 6 : index
    %c0_40 = arith.constant 0 : index
    %c0_41 = arith.constant 0 : index
    %80 = vector.load %arg2[%c6_39, %c0_40, %c0_41] : memref<12x8x256xf32, #tpu.memory_space<vmem>>, vector<1x8x256xf32>
    %81 = vector.shape_cast %80 : vector<1x8x256xf32> to vector<8x256xf32>
    %82 = arith.mulf %81, %79 : vector<8x256xf32>
    %83 = arith.addf %72, %82 : vector<8x256xf32>
    %c0_42 = arith.constant 0 : index
    %c7 = arith.constant 7 : index
    %84 = vector.load %arg3[%c0_42, %c7] : memref<8x12xf32, #tpu.memory_space<vmem>>, vector<8x1xf32>
    %c0_43 = arith.constant 0 : index
    %c7_44 = arith.constant 7 : index
    %85 = vector.load %arg4[%c0_43, %c7_44] : memref<8x12xf32, #tpu.memory_space<vmem>>, vector<8x1xf32>
    %86 = vector.broadcast %84 : vector<8x1xf32> to vector<8x256xf32>
    %87 = arith.mulf %5, %86 : vector<8x256xf32>
    %88 = math.exp %87 : vector<8x256xf32>
    %89 = vector.broadcast %85 : vector<8x1xf32> to vector<8x256xf32>
    %90 = arith.mulf %88, %89 : vector<8x256xf32>
    %c7_45 = arith.constant 7 : index
    %c0_46 = arith.constant 0 : index
    %c0_47 = arith.constant 0 : index
    %91 = vector.load %arg2[%c7_45, %c0_46, %c0_47] : memref<12x8x256xf32, #tpu.memory_space<vmem>>, vector<1x8x256xf32>
    %92 = vector.shape_cast %91 : vector<1x8x256xf32> to vector<8x256xf32>
    %93 = arith.mulf %92, %90 : vector<8x256xf32>
    %94 = arith.addf %83, %93 : vector<8x256xf32>
    %c0_48 = arith.constant 0 : index
    %c8 = arith.constant 8 : index
    %95 = vector.load %arg3[%c0_48, %c8] : memref<8x12xf32, #tpu.memory_space<vmem>>, vector<8x1xf32>
    %c0_49 = arith.constant 0 : index
    %c8_50 = arith.constant 8 : index
    %96 = vector.load %arg4[%c0_49, %c8_50] : memref<8x12xf32, #tpu.memory_space<vmem>>, vector<8x1xf32>
    %97 = vector.broadcast %95 : vector<8x1xf32> to vector<8x256xf32>
    %98 = arith.mulf %5, %97 : vector<8x256xf32>
    %99 = math.exp %98 : vector<8x256xf32>
    %100 = vector.broadcast %96 : vector<8x1xf32> to vector<8x256xf32>
    %101 = arith.mulf %99, %100 : vector<8x256xf32>
    %c8_51 = arith.constant 8 : index
    %c0_52 = arith.constant 0 : index
    %c0_53 = arith.constant 0 : index
    %102 = vector.load %arg2[%c8_51, %c0_52, %c0_53] : memref<12x8x256xf32, #tpu.memory_space<vmem>>, vector<1x8x256xf32>
    %103 = vector.shape_cast %102 : vector<1x8x256xf32> to vector<8x256xf32>
    %104 = arith.mulf %103, %101 : vector<8x256xf32>
    %105 = arith.addf %94, %104 : vector<8x256xf32>
    %c0_54 = arith.constant 0 : index
    %c9 = arith.constant 9 : index
    %106 = vector.load %arg3[%c0_54, %c9] : memref<8x12xf32, #tpu.memory_space<vmem>>, vector<8x1xf32>
    %c0_55 = arith.constant 0 : index
    %c9_56 = arith.constant 9 : index
    %107 = vector.load %arg4[%c0_55, %c9_56] : memref<8x12xf32, #tpu.memory_space<vmem>>, vector<8x1xf32>
    %108 = vector.broadcast %106 : vector<8x1xf32> to vector<8x256xf32>
    %109 = arith.mulf %5, %108 : vector<8x256xf32>
    %110 = math.exp %109 : vector<8x256xf32>
    %111 = vector.broadcast %107 : vector<8x1xf32> to vector<8x256xf32>
    %112 = arith.mulf %110, %111 : vector<8x256xf32>
    %c9_57 = arith.constant 9 : index
    %c0_58 = arith.constant 0 : index
    %c0_59 = arith.constant 0 : index
    %113 = vector.load %arg2[%c9_57, %c0_58, %c0_59] : memref<12x8x256xf32, #tpu.memory_space<vmem>>, vector<1x8x256xf32>
    %114 = vector.shape_cast %113 : vector<1x8x256xf32> to vector<8x256xf32>
    %115 = arith.mulf %114, %112 : vector<8x256xf32>
    %116 = arith.addf %105, %115 : vector<8x256xf32>
    %c0_60 = arith.constant 0 : index
    %c10 = arith.constant 10 : index
    %117 = vector.load %arg3[%c0_60, %c10] : memref<8x12xf32, #tpu.memory_space<vmem>>, vector<8x1xf32>
    %c0_61 = arith.constant 0 : index
    %c10_62 = arith.constant 10 : index
    %118 = vector.load %arg4[%c0_61, %c10_62] : memref<8x12xf32, #tpu.memory_space<vmem>>, vector<8x1xf32>
    %119 = vector.broadcast %117 : vector<8x1xf32> to vector<8x256xf32>
    %120 = arith.mulf %5, %119 : vector<8x256xf32>
    %121 = math.exp %120 : vector<8x256xf32>
    %122 = vector.broadcast %118 : vector<8x1xf32> to vector<8x256xf32>
    %123 = arith.mulf %121, %122 : vector<8x256xf32>
    %c10_63 = arith.constant 10 : index
    %c0_64 = arith.constant 0 : index
    %c0_65 = arith.constant 0 : index
    %124 = vector.load %arg2[%c10_63, %c0_64, %c0_65] : memref<12x8x256xf32, #tpu.memory_space<vmem>>, vector<1x8x256xf32>
    %125 = vector.shape_cast %124 : vector<1x8x256xf32> to vector<8x256xf32>
    %126 = arith.mulf %125, %123 : vector<8x256xf32>
    %127 = arith.addf %116, %126 : vector<8x256xf32>
    %c0_66 = arith.constant 0 : index
    %c11 = arith.constant 11 : index
    %128 = vector.load %arg3[%c0_66, %c11] : memref<8x12xf32, #tpu.memory_space<vmem>>, vector<8x1xf32>
    %c0_67 = arith.constant 0 : index
    %c11_68 = arith.constant 11 : index
    %129 = vector.load %arg4[%c0_67, %c11_68] : memref<8x12xf32, #tpu.memory_space<vmem>>, vector<8x1xf32>
    %130 = vector.broadcast %128 : vector<8x1xf32> to vector<8x256xf32>
    %131 = arith.mulf %5, %130 : vector<8x256xf32>
    %132 = math.exp %131 : vector<8x256xf32>
    %133 = vector.broadcast %129 : vector<8x1xf32> to vector<8x256xf32>
    %134 = arith.mulf %132, %133 : vector<8x256xf32>
    %c11_69 = arith.constant 11 : index
    %c0_70 = arith.constant 0 : index
    %c0_71 = arith.constant 0 : index
    %135 = vector.load %arg2[%c11_69, %c0_70, %c0_71] : memref<12x8x256xf32, #tpu.memory_space<vmem>>, vector<1x8x256xf32>
    %136 = vector.shape_cast %135 : vector<1x8x256xf32> to vector<8x256xf32>
    %137 = arith.mulf %136, %134 : vector<8x256xf32>
    %138 = arith.addf %127, %137 : vector<8x256xf32>
    %c0_72 = arith.constant 0 : index
    %c0_73 = arith.constant 0 : index
    %139 = vector.load %arg5[%c0_72, %c0_73] : memref<8x256xf32, #tpu.memory_space<vmem>>, vector<8x256xf32>
    tpu.vector_store %arg5[%c0_72, %c0_73], %138 {strides = array<i32>} : memref<8x256xf32, #tpu.memory_space<vmem>>, vector<8x256xf32>,
    %c0_i32 = arith.constant 0 : i32
    %140 = arith.cmpi eq, %arg1, %c0_i32 : i32
    %141 = arith.extui %140 : i1 to i32
    %c0_i32_74 = arith.constant 0 : i32
    %142 = arith.cmpi ne, %141, %c0_i32_74 : i32
    scf.if %142 {
      %cst_80 = arith.constant 0.000000e+00 : f32
      %149 = vector.broadcast %cst_80 : f32 to vector<8x1xf32>
      %c0_81 = arith.constant 0 : index
      %c0_82 = arith.constant 0 : index
      %150 = vector.load %arg6[%c0_81, %c0_82] : memref<8x1xf32, #tpu.memory_space<vmem>>, vector<8x1xf32>
      tpu.vector_store %arg6[%c0_81, %c0_82], %149 {strides = array<i32>} : memref<8x1xf32, #tpu.memory_space<vmem>>, vector<8x1xf32>,
    } else {
    }
    %c0_75 = arith.constant 0 : index
    %c0_76 = arith.constant 0 : index
    %143 = vector.load %arg6[%c0_75, %c0_76] : memref<8x1xf32, #tpu.memory_space<vmem>>, vector<8x1xf32>
    %144 = arith.mulf %138, %138 : vector<8x256xf32>
    %cst_77 = arith.constant dense<0.000000e+00> : vector<8xf32>
    %145 = vector.multi_reduction <add>, %144, %cst_77 [1] : vector<8x256xf32> to vector<8xf32>
    %146 = vector.shape_cast %145 : vector<8xf32> to vector<8x1xf32>
    %147 = arith.addf %143, %146 : vector<8x1xf32>
    %c0_78 = arith.constant 0 : index
    %c0_79 = arith.constant 0 : index
    %148 = vector.load %arg6[%c0_78, %c0_79] : memref<8x1xf32, #tpu.memory_space<vmem>>, vector<8x1xf32>
    tpu.vector_store %arg6[%c0_78, %c0_79], %147 {strides = array<i32>} : memref<8x1xf32, #tpu.memory_space<vmem>>, vector<8x1xf32>,
    return
  }
  func.func @transform_0(%arg0: i32, %arg1: i32) -> (i32, i32, i32) {
    %c0_i32 = arith.constant 0 : i32
    %c0_i32_0 = arith.constant 0 : i32
    return %c0_i32, %arg0, %arg1 : i32, i32, i32
  }
  func.func @transform_1(%arg0: i32, %arg1: i32) -> (i32, i32) {
    %c0_i32 = arith.constant 0 : i32
    %c0_i32_0 = arith.constant 0 : i32
    return %arg0, %c0_i32 : i32, i32
  }
  func.func @transform_2(%arg0: i32, %arg1: i32) -> (i32, i32) {
    %c0_i32 = arith.constant 0 : i32
    %c0_i32_0 = arith.constant 0 : i32
    return %arg0, %c0_i32 : i32, i32
  }
  func.func @transform_3(%arg0: i32, %arg1: i32) -> (i32, i32) {
    %c0_i32 = arith.constant 0 : i32
    return %arg0, %arg1 : i32, i32
  }
  func.func @transform_4(%arg0: i32, %arg1: i32) -> (i32, i32) {
    %c0_i32 = arith.constant 0 : i32
    %c0_i32_0 = arith.constant 0 : i32
    return %arg0, %c0_i32 : i32, i32
  }
}

</mosaic_0001>

<bundles_post_ra>
// kernel: tpu_custom_call.1
= control target key start
LH: loop header
LB: loop body
LE: loop exit
PB: predicated region body
PF: predicated region fallthrough
CT: control target
= control target key end

     0   :  { %s1427_s0 = inlined_call_operand.hbm [shape: f32[12,8,512], index: 0, kind: input, shape index: {}]   ;;  %s1428_s1 = inlined_call_operand.hbm [shape: f32[8,12], index: 1, kind: input, shape index: {}]   ;;  %s1429_s2 = inlined_call_operand.hbm [shape: f32[8,12], index: 2, kind: input, shape index: {}]   ;;  %s1430_s3 = inlined_call_operand.hbm [shape: f32[8,512], index: 3, kind: output, shape index: {0}]   ;;  %s1431_s4 = inlined_call_operand.vmem [shape: f32[8,1], index: 4, kind: output, shape index: {1}]  }
   0x1   :  { %1434 = sst [smem:[#allocation13_spill]] %s1428_s1 }
   0x2   :  { %1435 = sst [smem:[#allocation14_spill]] %s1429_s2 }
   0x3   :  { %10 = vsyncpa [#allocation3], 0 }
   0x4   :  { %12 = vsyncpa [#allocation3 + $0x1], 0 }
   0x5   :  { %13 = vsyncpa [#allocation6], 0 }
   0x6   :  { %14 = vsyncpa [#allocation4], 0 }
   0x7   :  { %16 = vsyncpa [#allocation4 + $0x1], 0  ;;  %s1187_s15 = smov 0   ;;  %s1189_s16 = smov 0  }
   0x8   :  { %s1191_s17 = smov 0   ;;  %s1193_s18 = smov 0  }
   0x9   :  { %s1195_s19 = smov 0   ;;  %s1197_s20 = smov 0  }
   0xa LB: > { %1436 = sst [smem:[#allocation12_spill]] %s1142_s20  ;;  %s752_s21 = sadd.s32 4294967295, %s1142_s20   ;;  %s1142_s20 = sphi %s1197_s20, %s22_s20   ;;  %s1138_s19 = sphi %s1195_s19, %s1451_s19   ;;  %s1134_s18 = sphi %s1193_s18, %s1450_s18   ;;  %s1130_s17 = sphi %s1191_s17, %s1449_s17   ;;  %s1126_s16 = sphi %s1189_s16, %s1448_s16   ;;  %s1122_s15 = sphi %s1187_s15, %s1447_s15  }
   0xb   : > { %s753_s22 = sadd.s32 4294967294, %s1142_s20   ;;  %s43_s23 = sadd.s32 1, %s1130_s17 }
   0xc   : > { %p50_p0 = scmp.ne.s32.totalorder %s1130_s17, %s1126_s16  ;;  %p51_p1 = scmp.eq.s32.totalorder %s1142_s20, 0 }
   0xd   : > { %p56_p2 = scmp.ne.s32.totalorder %s1126_s16, %s1122_s15  ;;  %p1225_p3 = scmp.eq.s32.totalorder %s752_s21, 0 }
   0xe   : > { %p134_p4 = scmp.eq.s32.totalorder %s752_s21, 1  ;;  %p1229_p5 = por %p51_p1, %p50_p0 }
   0xf   : > { %p140_p6 = scmp.eq.s32.totalorder %s753_s22, 1  ;;  %p1235_p7 = por %p1225_p3, %p56_p2 }
  0x10   : > { %p1239_p8 = por %p134_p4, %p50_p0  ;;  %p754_p10 = scmp.ge.s32.totalorder %s1142_s20, 1 }
  0x11   : > { %p1243_p9 = por %p140_p6, %p56_p2  ;;  %p173_p11 = scmp.lt.s32.totalorder %s1142_s20, 3 }
  0x12   : > { %s1442_s1 = sld [smem:[#allocation13_spill]]  ;;  %s1144_s7 = smov [#allocation5]  }
  0x13   : > { %p1252_p12 = pnand %p754_p10, %p173_p11  ;;  %s189_s8 = sshll.u32 %s1144_s7, 4  ;;  %s190_s8 = int_to_ptr.vmem [resolvable:$true] %s189_s8 }
  0x14   : > { %p757_p13 = scmp.ge.s32.totalorder %s1142_s20, 2  ;;  %p827_p1 = scmp.lt.s32.totalorder %s1142_s20, 2 }
  0x15   : > { %p810_p0 = pneg %p1252_p12  ;;  %s1444_s2 = sld [smem:[#allocation14_spill]] }
  0x16   : > { %p1267_p4 = pnand %p827_p1, %p1229_p5  ;;  %s1145_s13 = smov [#allocation7]  }
  0x17   : > { %p811_p2 = pnand %p810_p0, %p1225_p3  ;;  %s203_s14 = sshll.u32 %s1145_s13, 4  ;;  %s204_s14 = int_to_ptr.vmem [resolvable:$true] %s203_s14 }
  0x18   : > { %s187_s5 = sshll.u32 %s1442_s1, 4  ;;  %s214_s21 = sand.u32 1, %s1130_s17   ;;  %s188_s5 = int_to_ptr.hbm [resolvable:$true] %s187_s5 }
  0x19   : > { %813 = dma.hbm_to_vmem [thread:$0]  (!%p811_p2), %s188_s5, 128, %s190_s8, [#allocation6]  }
  0x1a   : > { %s31_s22 = sadd.s32 1, %s1138_s19  ;;  %s796_s29 = smul.u32 192, %s214_s21 }
  0x1b   : > { %s201_s11 = sshll.u32 %s1444_s2, 4  ;;  %p32_p6 = scmp.ge.s32.totalorder %s31_s22, 2  ;;  %s202_s11 = int_to_ptr.hbm [resolvable:$true] %s201_s11 }
  0x1c   : > { %816 = dma.hbm_to_vmem [thread:$0]  (!%p811_p2), %s202_s11, 128, %s204_s14, [#allocation6]  }
  0x1d   : > { %s794_s30 = sshll.u32 %s1138_s19, 4  ;;  %s1453_s22 = smov (%p32_p6, %s31_s22), 0 }
  0x1e   : > { %s225_s9 = scalar_lea.hbm %s1427_s0, %s794_s30  ;;  %s218_s13 = scalar_lea.vmem [#allocation2], %s796_s29 }
  0x1f   : > { %s226_s10 = sshll.u32 %s225_s9, 4  ;;  %s228_s5 = sshll.u32 %s218_s13, 4  ;;  %s227_s10 = int_to_ptr.hbm [resolvable:$true] %s226_s10  ;;  %s229_s5 = int_to_ptr.vmem [resolvable:$true] %s228_s5 }
  0x20   : > { %s39_s8 = ssub.s32 %s1138_s19, %s1453_s22  ;;  %s215_s14 = scalar_lea.sflag [#allocation3], %s214_s21 }
  0x21   : > { %p41_p5 = scmp.eq.s32.totalorder %s39_s8, 0  ;;  %s1146_s1 = smov 512  }
  0x22   : > { %s1147_s2 = smov 256   ;;  %s1148_s20 = smov 16  }
  0x23   : > { %s1284_s11 = scalar_select %p41_p5, %s1130_s17, %s43_s23  }
  0x24   : > { %820 = dma.hbm_to_vmem [thread:$0]  (!%p1267_p4), %s227_s10, 3072, %s229_s5, %s215_s14, %s1146_s1, %s1147_s2, %s1148_s20  }
  0x25   : > { %240 = sbr.rel (%p1252_p12) target bundleno = 368 (0x170), region = 32  ;;  %s1291_s29 = sand.u32 (!%p1252_p12), 1, %s1126_s16  }
  0x26   : > { %s797_s30 = smul.u32 (!%p1252_p12), 192, %s1291_s29  ;;  %s243_s7 = scalar_lea.sflag (!%p1252_p12), [#allocation3], %s1291_s29 }
  0x28   : > { %s1295_s25 = scalar_lea.vmem (!%p1252_p12), [#allocation2], %s797_s30 }
  0x2a   : > { %1109 = dma.done.wait (%p1235_p7), %s243_s7, 3072  }
  0x2b   : > { %1111 = vsyncadd (%p1235_p7), %s243_s7, 4294964224 }
  0x2c   : > { %1113 = dma.done.wait (%p1225_p3), [#allocation6], 256  }
  0x2d   : > { %1115 = vsyncadd (%p1225_p3), [#allocation6], 4294967040  ;;  %v1149_v0 = vmov 1   ;;  %v1150_v1 = vmov 0   ;;  %v1151_v2 = vmov 2   ;;  %v302_v3 = vld [vmem:[#allocation5] sm:$0xff]  ;;  %v294_v17 = vlaneseq }
  0x2e   : > { %898 = vset.pattern.permute.xlu1 %v1149_v0  ;;  %897 = vset.pattern.permute.xlu0 %v1150_v1  ;;  %v303_v4 = vld [vmem:[#allocation7] sm:$0xff]  ;;  %v1152_v5 = vmov 3   ;;  %v1153_v6 = vmov 4   ;;  %v1154_v7 = vmov 5   ;;  %v1155_v8 = vmov 6   ;;  %s764_s1 = sshll.u32 %s1134_s18, 8 }
  0x2f   : > { %899 = vset.pattern.permute.xlu2 %v1151_v2  ;;  %329 = vperm.xlu1 %898, %v302_v3   ;;  %v1156_v9 = vmov 9   ;;  %v1157_v10 = vmov 7   ;;  %v1158_v11 = vmov 8   ;;  %v1159_v12 = vmov 11   ;;  %s293_s2 = scvt.s32.f32 %s764_s1  ;;  %s763_s20 = sshll.u32 %s1291_s29, 4 }
  0x30   : > { %306 = vperm.xlu0 %897, %v302_v3   ;;  %352 = vperm.xlu2 %899, %v302_v3   ;;  %v1160_v13 = vmov 10   ;;  %v295_v19 = vand.u32 127, %v294_v17  ;;  %s279_s23 = scalar_lea.vmem [#allocation8], %s763_s20  ;;  %p787_p3 = scmp.ne.s32.totalorder %s1134_s18, 0 }
  0x31   : > { %v299_v25 = vstv %s293_s2 }
  0x32   : > { %v296_v22 = vadd.s32 128, %v295_v19  ;;  %v297_v23 = vcvt.s32.f32 %v295_v19 }
  0x34   : > { %v298_v24 = vcvt.s32.f32 %v296_v22  ;;  %v1310_v28 = vadd.f32 %v299_v25, %v297_v23 }
  0x36   : > { %v1312_v29 = vadd.f32 %v299_v25, %v298_v24 }
  0x37   : > { %339 = vperm.xlu1 %898, %v303_v4  }
  0x38   : > { %317 = vperm.xlu0 %897, %v303_v4   ;;  %362 = vperm.xlu2 %899, %v303_v4  }
  0x3f   : > { %901 = vset.pattern.permute.xlu1 %v1152_v5 }
  0x40   : > { %900 = vset.pattern.permute.xlu0 %v1152_v5  ;;  %385 = vperm.xlu1 %901, %v303_v4  }
  0x41   : > { %375 = vperm.xlu0 %900, %v302_v3   ;;  %902 = vset.pattern.permute.xlu2 %v1153_v6 }
  0x42   : > { %398 = vperm.xlu2 %902, %v302_v3  }
  0x48   : > { %903 = vset.pattern.permute.xlu1 %v1153_v6 }
  0x49   : > { %905 = vset.pattern.permute.xlu0 %v1154_v7  ;;  %408 = vperm.xlu1 %903, %v303_v4  }
  0x4a   : > { %431 = vperm.xlu0 %905, %v303_v4   ;;  %904 = vset.pattern.permute.xlu2 %v1154_v7 }
  0x4b   : > { %421 = vperm.xlu2 %904, %v302_v3  }
  0x51   : > { %906 = vset.pattern.permute.xlu1 %v1155_v8 }
  0x52   : > { %910 = vset.pattern.permute.xlu0 %v1156_v9  ;;  %444 = vperm.xlu1 %906, %v302_v3   ;;  %v766_v9 = vld [vmem:[%s1295_s25 + $0x18] sm:$0xff] }
  0x53   : > { %513 = vperm.xlu0 %910, %v302_v3   ;;  %907 = vset.pattern.permute.xlu2 %v1155_v8 }
  0x54   : > { %454 = vperm.xlu2 %907, %v303_v4  }
  0x5a   : > { %908 = vset.pattern.permute.xlu1 %v1157_v10 }
  0x5b   : > { %523 = vperm.xlu0 %910, %v303_v4   ;;  %467 = vperm.xlu1 %908, %v302_v3  }
  0x5c   : > { %909 = vset.pattern.permute.xlu2 %v1158_v11 }
  0x5d   : > { %490 = vperm.xlu2 %909, %v302_v3  }
  0x63   : > { %917 = vset.pattern.permute.xlu0 %v1159_v12  ;;  %911 = vset.pattern.permute.xlu1 %v1160_v13 }
  0x64   : > { %536 = vperm.xlu1 %911, %v302_v3  }
  0x65   : > { %912 = vset.pattern.permute.xlu2 %v1159_v12 }
  0x66   : > { %559 = vperm.xlu2 %912, %v302_v3   ;;  %v765_v3 = vld [vmem:[%s1295_s25 + $0x10] sm:$0xff] }
  0x6c   : > { %913 = vset.pattern.permute.xlu1 %v1157_v10  ;;  %v322_v10 = vld [vmem:[%s1295_s25] sm:$0xff] }
  0x6d   : > { %477 = vperm.xlu1 %913, %v303_v4  }
  0x6e   : > { %914 = vset.pattern.permute.xlu2 %v1158_v11  ;;  %v323_v11 = vld [vmem:[%s1295_s25 + $0x8] sm:$0xff] }
  0x6f   : > { %500 = vperm.xlu2 %914, %v303_v4  }
  0x75   : > { %915 = vset.pattern.permute.xlu1 %v1160_v13 }
  0x76   : > { %546 = vperm.xlu1 %915, %v303_v4  }
  0x77   : > { %916 = vset.pattern.permute.xlu2 %v1159_v12 }
  0x78   : > { %569 = vperm.xlu2 %916, %v303_v4  }
  0x8a   : > { %v353_v14 = vpop.permute.xlu2 %352 }
  0x8b   : > { %v355_v40 = vmul.f32 %v353_v14, %v1310_v28  ;;  %v356_v42 = vmul.f32 %v353_v14, %v1312_v29 }
  0x8d   : > { %v357_v46 = vmul.f32 1.442695, %v355_v40  ;;  %v359_v48 = vmul.f32 1.442695, %v356_v42 }
  0x92   : > { %v1305_v16 = vpop.permute.xlu2 %362 }
  0x9c   : > { %v399_v21 = vpop.permute.xlu2 %398 }
  0x9d   : > { %v401_v47 = vmul.f32 %v399_v21, %v1310_v28  ;;  %v402_v49 = vmul.f32 %v399_v21, %v1312_v29 }
  0x9f   : > { %v403_v55 = vmul.f32 1.442695, %v401_v47  ;;  %v405_v60 = vmul.f32 1.442695, %v402_v49 }
  0xa1   : > { %v330_v15 = vpop.permute.xlu1 %329 }
  0xa2   : > { %v307_v18 = vpop.permute.xlu0 %306  ;;  %v332_v30 = vmul.f32 %v330_v15, %v1310_v28  ;;  %v333_v32 = vmul.f32 %v330_v15, %v1312_v29 }
  0xa3   : > { %v309_v33 = vmul.f32 %v307_v18, %v1310_v28  ;;  %v310_v34 = vmul.f32 %v307_v18, %v1312_v29 }
  0xa4   : > { %v334_v35 = vmul.f32 1.442695, %v332_v30  ;;  %v336_v36 = vmul.f32 1.442695, %v333_v32 }
  0xa5   : > { %v422_v31 = vpop.permute.xlu2 %421  ;;  %v311_v37 = vmul.f32 1.442695, %v309_v33  ;;  %v313_v41 = vmul.f32 1.442695, %v310_v34  ;;  %v768_v34 = vld [vmem:[%s1295_s25 + $0x28] sm:$0xff] }
  0xa6   : > { %918 = vpow2.f32 %v334_v35  ;;  %v424_v53 = vmul.f32 %v422_v31, %v1310_v28  ;;  %v425_v56 = vmul.f32 %v422_v31, %v1312_v29 }
  0xa7   : > { %920 = vpow2.f32 %v336_v36  ;;  %v769_v36 = vld [vmem:[%s1295_s25 + $0x30] sm:$0xff] }
  0xa8   : > { %922 = vpow2.f32 %v311_v37  ;;  %v426_v61 = vmul.f32 1.442695, %v424_v53  ;;  %v428_v0 = vmul.f32 1.442695, %v425_v56 }
  0xa9   : > { %v340_v20 = vpop.permute.xlu1 %339  ;;  %924 = vpow2.f32 %v313_v41 }
  0xaa   : > { %v318_v26 = vpop.permute.xlu0 %317  ;;  %926 = vpow2.f32 %v357_v46 }
  0xab   : > { %928 = vpow2.f32 %v359_v48 }
  0xac   : > { %v919_v51 = vpop.eup %918 }
  0xad   : > { %v921_v54 = vpop.eup %920  ;;  %v342_v63 = vmul.f32 %v919_v51, %v340_v20 }
  0xae   : > { %v1322_v43 = vpop.permute.xlu2 %454  ;;  %v923_v58 = vpop.eup %922  ;;  %v343_v4 = vmul.f32 %v921_v54, %v340_v20 }
  0xaf   : > { %v925_v59 = vpop.eup %924  ;;  %v320_v5 = vmul.f32 %v923_v58, %v318_v26  ;;  %v347_v14 = vmul.f32 %v765_v3, %v342_v63  ;;  %v772_v3 = vld [vmem:[%s1295_s25 + $0x48] sm:$0xff] }
  0xb0   : > { %v321_v6 = vmul.f32 %v925_v59, %v318_v26  ;;  %v927_v8 = vpop.eup %926  ;;  %v348_v18 = vmul.f32 %v766_v9, %v343_v4  ;;  %v767_v26 = vld [vmem:[%s1295_s25 + $0x20] sm:$0xff] }
  0xb1   : > { %v929_v12 = vpop.eup %928  ;;  %v324_v19 = vmul.f32 %v322_v10, %v320_v5  ;;  %v365_v24 = vmul.f32 %v927_v8, %v1305_v16  ;;  %v773_v8 = vld [vmem:[%s1295_s25 + $0x50] sm:$0xff] }
  0xb2   : > { %v1308_v27 = vpop.permute.xlu1 %385  ;;  %v325_v20 = vmul.f32 %v323_v11, %v321_v6  ;;  %v366_v30 = vmul.f32 %v929_v12, %v1305_v16  ;;  %v774_v11 = vld [vmem:[%s1295_s25 + $0x58] sm:$0xff] }
  0xb3   : > { %v376_v38 = vpop.permute.xlu0 %375  ;;  %v349_v41 = vadd.f32 %v347_v14, %v324_v19  ;;  %v370_v47 = vmul.f32 %v767_v26, %v365_v24 }
  0xb4   : > { %v378_v44 = vmul.f32 %v376_v38, %v1310_v28  ;;  %v379_v45 = vmul.f32 %v376_v38, %v1312_v29  ;;  %v350_v42 = vadd.f32 %v348_v18, %v325_v20  ;;  %v371_v49 = vmul.f32 %v768_v34, %v366_v30 }
  0xb6   : > { %v380_v50 = vmul.f32 1.442695, %v378_v44  ;;  %v382_v52 = vmul.f32 1.442695, %v379_v45  ;;  %v770_v44 = vld [vmem:[%s1295_s25 + $0x38] sm:$0xff]  ;;  %v373_v56 = vadd.f32 %v371_v49, %v350_v42  ;;  %v780_v49 = vld [vmem:[%s1295_s25 + $0x88] sm:$0xff] }
  0xb7   : > { %v491_v62 = vpop.permute.xlu2 %490 }
  0xb8   : > { %930 = vpow2.f32 %v380_v50  ;;  %v493_v25 = vmul.f32 %v491_v62, %v1310_v28  ;;  %v494_v32 = vmul.f32 %v491_v62, %v1312_v29 }
  0xb9   : > { %932 = vpow2.f32 %v382_v52 }
  0xba   : > { %934 = vpow2.f32 %v403_v55  ;;  %v495_v48 = vmul.f32 1.442695, %v493_v25  ;;  %v372_v55 = vadd.f32 %v370_v47, %v349_v41 }
  0xbb   : > { %v1318_v39 = vpop.permute.xlu1 %408  ;;  %936 = vpow2.f32 %v405_v60  ;;  %v771_v60 = vld [vmem:[%s1295_s25 + $0x40] sm:$0xff] }
  0xbc   : > { %v1330_v1 = vpop.permute.xlu0 %431  ;;  %938 = vpow2.f32 %v426_v61 }
  0xbd   : > { %940 = vpow2.f32 %v428_v0 }
  0xbe   : > { %v931_v13 = vpop.eup %930 }
  0xbf   : > { %v933_v17 = vpop.eup %932  ;;  %v388_v31 = vmul.f32 %v931_v13, %v1308_v27 }
  0xc0   : > { %v935_v23 = vpop.eup %934  ;;  %v389_v35 = vmul.f32 %v933_v17, %v1308_v27  ;;  %v560_v45 = vpop.permute.xlu2 %559  ;;  %v497_v27 = vmul.f32 1.442695, %v494_v32  ;;  %v775_v17 = vld [vmem:[%s1295_s25 + $0x60] sm:$0xff] }
  0xc1   : > { %v937_v33 = vpop.eup %936  ;;  %v393_v50 = vmul.f32 %v769_v36, %v388_v31  ;;  %v562_v6 = vmul.f32 %v560_v45, %v1310_v28  ;;  %v778_v36 = vld [vmem:[%s1295_s25 + $0x78] sm:$0xff] }
  0xc2   : > { %v939_v40 = vpop.eup %938  ;;  %v394_v52 = vmul.f32 %v770_v44, %v389_v35  ;;  %v412_v61 = vmul.f32 %v937_v33, %v1318_v39  ;;  %v777_v35 = vld [vmem:[%s1295_s25 + $0x70] sm:$0xff] }
  0xc3   : > { %v941_v46 = vpop.eup %940  ;;  %v434_v62 = vmul.f32 %v939_v40, %v1330_v1  ;;  %v395_v4 = vadd.f32 %v393_v50, %v372_v55  ;;  %v564_v20 = vmul.f32 1.442695, %v562_v6  ;;  %v783_v6 = vld [vmem:[%s1295_s25 + $0xa0] sm:$0xff] }
  0xc4   : > { %v445_v57 = vpop.permute.xlu1 %444  ;;  %v435_v63 = vmul.f32 %v941_v46, %v1330_v1  ;;  %v417_v13 = vmul.f32 %v772_v3, %v412_v61 }
  0xc5   : > { %v447_v2 = vmul.f32 %v445_v57, %v1310_v28  ;;  %v448_v7 = vmul.f32 %v445_v57, %v1312_v29  ;;  %v514_v38 = vpop.permute.xlu0 %513  ;;  %v411_v57 = vmul.f32 %v935_v23, %v1318_v39  ;;  %v563_v39 = vmul.f32 %v560_v45, %v1312_v29 }
  0xc6   : > { %v516_v51 = vmul.f32 %v514_v38, %v1310_v28  ;;  %v517_v54 = vmul.f32 %v514_v38, %v1312_v29  ;;  %v439_v19 = vmul.f32 %v773_v8, %v434_v62  ;;  %v440_v25 = vmul.f32 %v774_v11, %v435_v63  ;;  %v782_v62 = vld [vmem:[%s1295_s25 + $0x98] sm:$0xff] }
  0xc7   : > { %v449_v15 = vmul.f32 1.442695, %v447_v2  ;;  %v451_v21 = vmul.f32 1.442695, %v448_v7  ;;  %v396_v7 = vadd.f32 %v394_v52, %v373_v56  ;;  %v416_v10 = vmul.f32 %v771_v60, %v411_v57 }
  0xc8   : > { %v518_v5 = vmul.f32 1.442695, %v516_v51  ;;  %v520_v9 = vmul.f32 1.442695, %v517_v54  ;;  %v566_v26 = vmul.f32 1.442695, %v563_v39 }
  0xc9   : > { %942 = vpow2.f32 %v449_v15  ;;  %v418_v18 = vadd.f32 %v416_v10, %v395_v4  ;;  %v419_v24 = vadd.f32 %v417_v13, %v396_v7  ;;  %v784_v7 = vld [vmem:[%s1295_s25 + $0xa8] sm:$0xff] }
  0xca   : > { %944 = vpow2.f32 %v451_v21  ;;  %v501_v21 = vpop.permute.xlu2 %500 }
  0xcb   : > { %946 = vpow2.f32 %v495_v48  ;;  %v441_v34 = vadd.f32 %v439_v19, %v418_v18  ;;  %v442_v38 = vadd.f32 %v440_v25, %v419_v24  ;;  %v779_v48 = vld [vmem:[%s1295_s25 + $0x80] sm:$0xff] }
  0xcc   : > { %948 = vpow2.f32 %v497_v27 }
  0xcd   : > { %v468_v22 = vpop.permute.xlu1 %467  ;;  %v524_v45 = vpop.permute.xlu0 %523 }
  0xce   : > { %v470_v37 = vmul.f32 %v468_v22, %v1310_v28  ;;  %v471_v16 = vmul.f32 %v468_v22, %v1312_v29  ;;  %v776_v22 = vld [vmem:[%s1295_s25 + $0x68] sm:$0xff] }
  0xcf   : > { %v943_v59 = vpop.eup %942 }
  0xd0   : > { %v472_v53 = vmul.f32 1.442695, %v470_v37  ;;  %v474_v58 = vmul.f32 1.442695, %v471_v16  ;;  %v945_v2 = vpop.eup %944  ;;  %v457_v1 = vmul.f32 %v943_v59, %v1322_v43 }
  0xd1   : > { %v458_v14 = vmul.f32 %v945_v2, %v1322_v43  ;;  %v947_v23 = vpop.eup %946 }
  0xd2   : > { %950 = vpow2.f32 %v472_v53  ;;  %v462_v31 = vmul.f32 %v775_v17, %v457_v1  ;;  %v503_v44 = vmul.f32 %v947_v23, %v501_v21  ;;  %v570_v60 = vpop.permute.xlu2 %569  ;;  %v785_v1 = vld [vmem:[%s1295_s25 + $0xb0] sm:$0xff] }
  0xd3   : > { %952 = vpow2.f32 %v474_v58  ;;  %v781_v58 = vld [vmem:[%s1295_s25 + $0x90] sm:$0xff] }
  0xd4   : > { %954 = vpow2.f32 %v518_v5  ;;  %v464_v46 = vadd.f32 %v462_v31, %v441_v34  ;;  %v508_v56 = vmul.f32 %v779_v48, %v503_v44 }
  0xd5   : > { %956 = vpow2.f32 %v520_v9 }
  0xd6   : > { %v537_v0 = vpop.permute.xlu1 %536  ;;  %958 = vpow2.f32 %v564_v20 }
  0xd7   : > { %v539_v12 = vmul.f32 %v537_v0, %v1310_v28  ;;  %v540_v15 = vmul.f32 %v537_v0, %v1312_v29  ;;  %v949_v28 = vpop.eup %948  ;;  %v463_v29 = vmul.f32 %v776_v22, %v458_v14  ;;  %960 = vpow2.f32 %v566_v26 }
  0xd8   : > { %v951_v43 = vpop.eup %950  ;;  %v504_v16 = vmul.f32 %v949_v28, %v501_v21 }
  0xd9   : > { %v541_v30 = vmul.f32 1.442695, %v539_v12  ;;  %v543_v32 = vmul.f32 1.442695, %v540_v15  ;;  %v953_v33 = vpop.eup %952  ;;  %v465_v50 = vadd.f32 %v463_v29, %v442_v38  ;;  %v786_v12 = vld [vmem:[%s1295_s25 + $0xb8] sm:$0xff] }
  0xda   : > { %v955_v42 = vpop.eup %954  ;;  %v509_v57 = vmul.f32 %v780_v49, %v504_v16 }
  0xdb   : > { %962 = vpow2.f32 %v541_v30  ;;  %v957_v47 = vpop.eup %956  ;;  %v526_v52 = vmul.f32 %v955_v42, %v524_v45 }
  0xdc   : > { %964 = vpow2.f32 %v543_v32  ;;  %v959_v55 = vpop.eup %958  ;;  %v527_v59 = vmul.f32 %v957_v47, %v524_v45 }
  0xdd   : > { %v961_v61 = vpop.eup %960  ;;  %v531_v4 = vmul.f32 %v781_v58, %v526_v52  ;;  %v572_v5 = vmul.f32 %v959_v55, %v570_v60 }
  0xde   : > { %v532_v9 = vmul.f32 %v782_v62, %v527_v59  ;;  %v573_v39 = vmul.f32 %v961_v61, %v570_v60 }
  0xdf   : > { %v478_v37 = vpop.permute.xlu1 %477  ;;  %v577_v18 = vmul.f32 %v785_v1, %v572_v5 }
  0xe0   : > { %v480_v40 = vmul.f32 %v951_v43, %v478_v37  ;;  %v481_v41 = vmul.f32 %v953_v33, %v478_v37  ;;  %v578_v19 = vmul.f32 %v786_v12, %v573_v39 }
  0xe1   : > { %v963_v63 = vpop.eup %962 }
  0xe2   : > { %v485_v27 = vmul.f32 %v777_v35, %v480_v40  ;;  %v486_v51 = vmul.f32 %v778_v36, %v481_v41  ;;  %v965_v3 = vpop.eup %964 }
  0xe4   : > { %v487_v53 = vadd.f32 %v485_v27, %v464_v46  ;;  %v488_v54 = vadd.f32 %v486_v51, %v465_v50 }
  0xe6   : > { %v510_v0 = vadd.f32 %v508_v56, %v487_v53  ;;  %v511_v2 = vadd.f32 %v509_v57, %v488_v54 }
  0xe8   : > { %v547_v8 = vpop.permute.xlu1 %546  ;;  %v533_v13 = vadd.f32 %v531_v4, %v510_v0  ;;  %v534_v14 = vadd.f32 %v532_v9, %v511_v2 }
  0xe9   : > { %v549_v10 = vmul.f32 %v963_v63, %v547_v8  ;;  %v550_v11 = vmul.f32 %v965_v3, %v547_v8 }
  0xeb   : > { %v554_v15 = vmul.f32 %v783_v6, %v549_v10  ;;  %v555_v17 = vmul.f32 %v784_v7, %v550_v11 }
  0xed   : > { %v556_v20 = vadd.f32 %v554_v15, %v533_v13  ;;  %v557_v21 = vadd.f32 %v555_v17, %v534_v14 }
  0xee   : > { %586 = sbr.rel (%p787_p3) target bundleno = 245 (0xf5), region = 48 }
  0xef   : > { %v579_v22 = vadd.f32 %v577_v18, %v556_v20  ;;  %v580_v23 = vadd.f32 %v578_v19, %v557_v21 }
  0xf1   : > { %581 = vst [vmem:[%s279_s23] sm:$0xff] %v579_v22 }
  0xf2   : > { %582 = vst [vmem:[%s279_s23 + $0x8] sm:$0xff] %v580_v23 }
  0xf3   : > { %vm587_vm0 = vcmask 7168   ;;  %v1161_v24 = vmov 0.0  }
  0xf4   : > { %588 = vst.msk [vmem:[%s1431_s4] sm:$0xff] %vm587_vm0, %v1161_v24 }
  0xf5 PF: > { %v590_v25 = vmul.f32 %v579_v22, %v579_v22  ;;  %v591_v26 = vmul.f32 %v580_v23, %v580_v23  ;;  %s795_s6 = sshll.u32 %s1134_s18, 4  ;;  %s618_s10 = sshll.u32 %s279_s23, 4  ;;  %s619_s10 = int_to_ptr.vmem [resolvable:$true] %s618_s10 }
  0xf6   : > { %s616_s9 = scalar_lea.hbm %s1430_s3, %s795_s6  ;;  %s599_s5 = scalar_lea.sflag [#allocation4], %s1291_s29 }
  0xf7   : > { %v592_v28 = vadd.f32 %v591_v26, %v590_v25  ;;  %s620_s13 = sshll.u32 %s616_s9, 4  ;;  %s1076_s7 = scalar_lea.hbm %s1430_s3, 32  ;;  %s621_s13 = int_to_ptr.hbm [resolvable:$true] %s620_s13 }
  0xf8   : > { %s1070_s8 = sshra.s32 %s621_s13, 4  ;;  %s1071_s8 = int_to_ptr.hbm [resolvable:$true] %s1070_s8 }
  0xf9   : > { %593 = vadd.xlane.f32.xlu0 %v592_v28  ;;  %s1072_s14 = scalar_lea.hbm %s1071_s8, 16  ;;  %p1077_p12 = scmp.lt.s32.totalorder %s1071_s8, %s1430_s3 }
  0xfa   : > { %p1073_p7 = scmp.ne.s32.totalorder %s1071_s8, %s1072_s14  ;;  %p1078_p0 = scmp.lt.s32.totalorder %s1076_s7, %s1072_s14 }
  0xfc   : > { %p1074_p10 = pnand %p1073_p7, %p1239_p8  ;;  %p1079_p1 = por %p1078_p0, %p1077_p12 }
  0xfe   : > { %p1075_p11 = pneg %p1074_p10 }
 0x100   : > { %p1080_p2 = pnand %p1079_p1, %p1075_p11 }
 0x102   : > { %1083 = shalt.err (!%p1080_p2)
}
 0x103   : > { %808 = dma.vmem_to_hbm [thread:$0]  (%p1239_p8), %s619_s10, 256, %s621_s13, %s599_s5   ;;  %v589_v30 = vld [vmem:[%s1431_s4] sm:$0xff]  ;;  %vm596_vm1 = vcmask 7168  }
 0x16c   : > { %v594_v31 = vpop.xlane.xlu0 %593 }
 0x16d   : > { %v595_v43 = vadd.f32 %v594_v31, %v589_v30 }
 0x16f   : > { %597 = vst.msk [vmem:[%s1431_s4] sm:$0xff] %vm596_vm1, %v595_v43 }
 0x170 PF: > { %s1446_s24 = sld [smem:[#allocation12_spill]]  ;;  %s642_s26 = sand.u32 1, %s1122_s15  }
 0x171   : > { %p822_p4 = pnand %p757_p13, %p1243_p9  ;;  %s643_s27 = scalar_lea.sflag [#allocation4], %s642_s26 }
 0x173   : > { %p823_p8 = pneg %p822_p4 }
 0x175   : > { %1117 = dma.done.wait (%p823_p8), %s643_s27, 256  }
 0x176   : > { %1119 = vsyncadd (%p823_p8), %s643_s27, 4294967040  ;;  %s22_s20 = sadd.s32 1, %s1446_s24   ;;  %s1447_s15 = smov %s1126_s16 }
 0x177   : > { %p19_p6 = scmp.ge.s32.totalorder %s22_s20, 4   ;;  %s1448_s16 = smov %s1130_s17 }
 0x178   : > { %s1449_s17 = smov %s1284_s11  ;;  %s1450_s18 = smov %s1138_s19 }
 0x179   : > { %s1451_s19 = smov %s1453_s22  ;;  %21 = sbr.rel (!%p19_p6) target bundleno = 10 (0xa), region = 114 }
 0x17e   :  { %649 = vsyncpa [#allocation3], 1 }
 0x17f   :  { %651 = vsyncpa [#allocation3 + $0x1], 1 }
 0x180   :  { %652 = vsyncpa [#allocation6], 1 }
 0x181   :  { %653 = vsyncpa [#allocation4], 1 }
 0x182   :  { %655 = vsyncpa [#allocation4 + $0x1], 1 }

</bundles_post_ra>
